<compile_context>
chip_gen: v7x
topology: tpu7x:2x2x1
jax: 0.10.0
libtpu: 0.0.40
codegen_flags: <defaults>
</compile_context>

<pallas_src>
from functools import partial

import jax
import jax.numpy as jnp
from jax.experimental import pallas as pl
from jax.experimental.pallas import tpu as pltpu


def _round_up(a, m):
    return (a + m - 1) // m * m


# ----------------------------------------------------------------------------
# Pallas kernel: fused projection + add + relu + psi + sigmoid + gate
#   x_ref  : (F_l, tile)    x activations, pixels on lanes (act dtype)
#   g_ref  : (F_g, tile)    g activations                    (act dtype)
#   pre_ref: (F_int, tile)  precomputed  W_j(k)up4 + W_M(l)up2 (no bias)
#   wx_ref : (F_int, F_l)   W_x^T (conv+BN folded, act dtype)
#   wg_ref : (F_int, F_g)   W_g^T (conv+BN folded, act dtype)
#   b_ref  : (F_int, 1)     fused bias (bg + bx + bj + bm), f32
#   wp_ref : (F_int, 1)     psi conv+BN weight (column), f32
#   bp_ref : (1, 1)         psi bias, f32
#   out_ref: (F_l, tile)    x * sigmoid(psi)
# ----------------------------------------------------------------------------
def _attn_gate_kernel(x_ref, g_ref, pre_ref, wx_ref, wg_ref, b_ref, wp_ref,
                      bp_ref, out_ref):
    x = x_ref[...]                                       # stored dtype, no cast

    # two small MXU matmuls (bf16 in, f32 accumulation) — the fused projection
    s = jnp.dot(wx_ref[...], x, preferred_element_type=jnp.float32)
    s = s + jnp.dot(wg_ref[...], g_ref[...], preferred_element_type=jnp.float32)
    s = s + b_ref[...] + pre_ref[...].astype(jnp.float32)
    s = jnp.maximum(s, 0.0)                              # ReLU, (F_int, tile) f32

    # psi: lane-dense (1, tile) sublane reduction; sigmoid = exp + approx recip
    psi = jnp.sum(s * wp_ref[...], axis=0, keepdims=True) + bp_ref[...]
    psi = pl.reciprocal(1.0 + jnp.exp(-psi), approx=True)

    # gate x (bf16 * f32 promotes only the small F_l x tile product)
    out_ref[...] = (x * psi).astype(out_ref.dtype)


def attn_gate_pallas(x, g, pre, wx_t, wg_t, b, wp, bp, *, lane_tile=1024):
    """x: (N, F_l, P); g: (N, F_g, P); pre: (N, F_int, P); weights pre-cast."""
    n, f_l, p = x.shape
    f_g = g.shape[1]
    f_int = wx_t.shape[0]
    act_dtype = x.dtype
    dtype_bytes = jnp.dtype(act_dtype).itemsize

    # --- pick a lane tile that divides P (no jnp.pad / output-slice HBM copy)
    #     and keeps the total grid >= 2 steps so both v7x TCs get work.
    max_tile = min(lane_tile, p if n >= 2 else max(p // 2, 128))
    tile = 0
    cand = (max_tile // 128) * 128
    while cand >= 128:
        if p % cand == 0:
            tile = cand
            break
        cand -= 128
    if tile == 0:
        # ragged P (not hit by real U-Net shapes): fall back to padding.
        tile = min(max((lane_tile // 128) * 128, 128), _round_up(p, 128))
        p_pad = _round_up(p, tile)
        pad = ((0, 0), (0, 0), (0, p_pad - p))
        x, g, pre = jnp.pad(x, pad), jnp.pad(g, pad), jnp.pad(pre, pad)
    else:
        p_pad = p

    grid = (n, p_pad // tile)

    def lane_spec(c):
        return pl.BlockSpec((pl.Squeezed(), c, tile), lambda b_, i: (b_, 0, i))

    def full_spec(r, c):
        return pl.BlockSpec((r, c), lambda b_, i: (0, 0))

    # --- VMEM budget: double-buffered x/g/pre/out blocks + weights + headroom.
    blk_bytes = (2 * f_l + f_g + f_int) * tile * dtype_bytes
    wt_bytes = f_int * (f_l + f_g) * dtype_bytes + (2 * f_int + 2) * 4
    vmem_limit = int(min(max(3 * blk_bytes + wt_bytes + (2 << 20), 16 << 20),
                         48 << 20))

    # --- advisory cost estimate so XLA schedules the neighbours around us.
    cost = pl.CostEstimate(
        flops=int(2 * n * p * f_int * (f_l + f_g + 1)),
        transcendentals=int(n * p),
        bytes_accessed=int((2 * f_l + f_g + f_int) * n * p * dtype_bytes
                           + wt_bytes),
    )

    grid_spec = pltpu.PrefetchScalarGridSpec(
        num_scalar_prefetch=0,
        grid=grid,
        in_specs=[
            lane_spec(f_l),                # x
            lane_spec(f_g),                # g
            lane_spec(f_int),              # pre (low-res projections, upsampled)
            full_spec(f_int, f_l),         # W_x^T
            full_spec(f_int, f_g),         # W_g^T
            full_spec(f_int, 1),           # fused bias
            full_spec(f_int, 1),           # psi weight
            full_spec(1, 1),               # psi bias
        ],
        out_specs=lane_spec(f_l),
    )

    out = pl.pallas_call(
        _attn_gate_kernel,
        out_shape=jax.ShapeDtypeStruct((n, f_l, p_pad), act_dtype),
        grid_spec=grid_spec,
        compiler_params=pltpu.CompilerParams(
            dimension_semantics=("parallel", "parallel"),
            vmem_limit_bytes=vmem_limit),
        cost_estimate=cost,
    )(x, g, pre, wx_t, wg_t, b, wp, bp)

    return out if p_pad == p else out[:, :, :p]


# ----------------------------------------------------------------------------
# Glue: param construction (1x1 conv + folded eval-mode BN), low-res
#       projections of k / l (1x1 conv commutes with nearest upsample).
# ----------------------------------------------------------------------------
def _fold_conv_bn(key, c_in, c_out, eps=1e-5):
    """Deterministic 1x1 conv + BatchNorm(eval) params, folded to (W, b)."""
    kw, kb, kg, kbt, km, kv = jax.random.split(key, 6)
    w = jax.random.normal(kw, (c_in, c_out), jnp.float32) * 0.1
    b = jax.random.normal(kb, (c_out,), jnp.float32) * 0.1
    gamma = 1.0 + 0.1 * jax.random.normal(kg, (c_out,), jnp.float32)
    beta = 0.1 * jax.random.normal(kbt, (c_out,), jnp.float32)
    mean = 0.1 * jax.random.normal(km, (c_out,), jnp.float32)
    var = 1.0 + 0.1 * jax.random.uniform(kv, (c_out,), jnp.float32)
    scale = gamma / jnp.sqrt(var + eps)
    return w * scale[None, :], (b - mean) * scale + beta


def _up2(t):
    # NCHW nearest-neighbor upsample by 2 (matches nn.Upsample(scale_factor=2))
    return jnp.repeat(jnp.repeat(t, 2, axis=2), 2, axis=3)


def _conv1x1(t, w):
    # NCHW 1x1 conv without bias; w: (c_in, c_out)
    return jnp.einsum('nchw,cf->nfhw', t, w)


def global_attention_l3_forward(g, x, k, l, params, *, lane_tile=1024,
                                act_dtype=jnp.bfloat16):
    """g,x: (N,Fg,H,W)/(N,Fl,H,W); k: (N,FK,H/4,W/4); l: (N,FM,H/2,W/2)."""
    n, f_l, h, w = x.shape
    f_g = g.shape[1]
    f_int = params["wg"].shape[1]
    p = h * w

    # k/l projected at LOW resolution (tiny matmuls), then only the F_int-wide
    # result is replicated to full resolution (1x1 conv / nearest-up commute).
    pre = _up2(_up2(_conv1x1(k, params["wj"]))) + _up2(_conv1x1(l, params["wm"]))

    # (N, C, H*W) views of contiguous NCHW tensors — no HBM transpose/concat.
    # TODO(synk): in the full U_Net the producers would emit bf16 directly;
    # the .astype here is the only extra HBM pass and only fires for bf16.
    x3 = x.reshape(n, f_l, p).astype(act_dtype)
    g3 = g.reshape(n, f_g, p).astype(act_dtype)
    pre3 = pre.reshape(n, f_int, p).astype(act_dtype)

    wx_t = params["wx"].T.astype(act_dtype)                     # (F_int, F_l)
    wg_t = params["wg"].T.astype(act_dtype)                     # (F_int, F_g)
    b = (params["bg"] + params["bx"] + params["bj"]
         + params["bm"]).reshape(f_int, 1).astype(jnp.float32)
    wp = params["wp"].reshape(f_int, 1).astype(jnp.float32)
    bp = params["bp"].reshape(1, 1).astype(jnp.float32)

    out3 = attn_gate_pallas(x3, g3, pre3, wx_t, wg_t, b, wp, bp,
                            lane_tile=lane_tile)
    return out3.reshape(n, f_l, h, w)


def _reference_forward(g, x, k, l, params):
    """Pure-JAX reference that follows the PyTorch module op-for-op."""
    def conv_bias(t, w, b):
        return _conv1x1(t, w) + b[None, :, None, None]
    g1 = conv_bias(g, params["wg"], params["bg"])
    x1 = conv_bias(x, params["wx"], params["bx"])
    m1 = conv_bias(_up2(_up2(k)), params["wj"], params["bj"])
    l1 = conv_bias(_up2(l), params["wm"], params["bm"])
    s = jnp.maximum(g1 + x1 + m1 + l1, 0.0)
    psi = jax.nn.sigmoid(conv_bias(s, params["wp"], params["bp"]))
    return x * psi


if __name__ == "__main__":
    # Small, shape-consistent example: H=W=16 so k is H/4 and l is H/2.
    N, H, W = 2, 16, 16
    F_g, F_l, F_K, F_M, F_int = 4, 4, 4, 4, 8

    key = jax.random.PRNGKey(0)
    kg, kx, kk, kl, kp = jax.random.split(key, 5)

    g = jax.random.normal(kg, (N, F_g, H, W), jnp.float32)
    x = jax.random.normal(kx, (N, F_l, H, W), jnp.float32)
    k = jax.random.normal(kk, (N, F_K, H // 4, W // 4), jnp.float32)
    l = jax.random.normal(kl, (N, F_M, H // 2, W // 2), jnp.float32)

    pkeys = jax.random.split(kp, 5)
    wg, bg = _fold_conv_bn(pkeys[0], F_g, F_int)
    wx, bx = _fold_conv_bn(pkeys[1], F_l, F_int)
    wj, bj = _fold_conv_bn(pkeys[2], F_K, F_int)
    wm, bm = _fold_conv_bn(pkeys[3], F_M, F_int)
    wp, bp = _fold_conv_bn(pkeys[4], F_int, 1)
    params = dict(wg=wg, bg=bg, wx=wx, bx=bx, wj=wj, bj=bj,
                  wm=wm, bm=bm, wp=wp, bp=bp)

    ref = jax.block_until_ready(_reference_forward(g, x, k, l, params))

    # f32 activation storage — tolerance covers the approx-reciprocal sigmoid.
    out_f32 = jax.block_until_ready(
        global_attention_l3_forward(g, x, k, l, params, act_dtype=jnp.float32))
    assert out_f32.shape == (N, F_l, H, W)
    assert out_f32.dtype == jnp.float32
    assert jnp.allclose(out_f32, ref, atol=5e-3, rtol=5e-3), \
        "mismatch vs reference (f32 path)"

    # default bf16 activation storage (bandwidth-optimal on all generations)
    out_bf16 = jax.block_until_ready(
        global_attention_l3_forward(g, x, k, l, params))
    assert out_bf16.shape == (N, F_l, H, W)
    max_err = float(jnp.max(jnp.abs(out_bf16.astype(jnp.float32) - ref)))
    assert max_err < 0.05, f"bf16 path error too large: {max_err}"

    print("KERNEL_OK")
</pallas_src>

<mosaic_0001>
module attributes {stable_mosaic.version = 11 : i64} {
  func.func @_attn_gate_kernel(%arg0: i32, %arg1: i32, %arg2: memref<1x4x256xf32, #tpu.memory_space<vmem>>, %arg3: memref<1x4x256xf32, #tpu.memory_space<vmem>>, %arg4: memref<1x8x256xf32, #tpu.memory_space<vmem>>, %arg5: memref<8x4xf32, #tpu.memory_space<vmem>>, %arg6: memref<8x4xf32, #tpu.memory_space<vmem>>, %arg7: memref<8x1xf32, #tpu.memory_space<vmem>>, %arg8: memref<8x1xf32, #tpu.memory_space<vmem>>, %arg9: memref<1x1xf32, #tpu.memory_space<vmem>>, %arg10: memref<1x4x256xf32, #tpu.memory_space<vmem>>) attributes {dimension_semantics = [#tpu.dimension_semantics<parallel>, #tpu.dimension_semantics<parallel>], iteration_bounds = array<i64: 2, 1>, scalar_prefetch = 0 : i64, scratch_operands = 0 : i64, tpu.core_type = #tpu.core_type<tc>, window_params = [{transform_indices = @transform_0, window_bounds = array<i64: 1, 4, 256>}, {transform_indices = @transform_1, window_bounds = array<i64: 1, 4, 256>}, {transform_indices = @transform_2, window_bounds = array<i64: 1, 8, 256>}, {pipeline_mode = #tpu.pipeline_mode<synchronous>, transform_indices = @transform_3, window_bounds = array<i64: 8, 4>}, {pipeline_mode = #tpu.pipeline_mode<synchronous>, transform_indices = @transform_4, window_bounds = array<i64: 8, 4>}, {pipeline_mode = #tpu.pipeline_mode<synchronous>, transform_indices = @transform_5, window_bounds = array<i64: 8, 1>}, {pipeline_mode = #tpu.pipeline_mode<synchronous>, transform_indices = @transform_6, window_bounds = array<i64: 8, 1>}, {pipeline_mode = #tpu.pipeline_mode<synchronous>, transform_indices = @transform_7, window_bounds = array<i64: 1, 1>}, {transform_indices = @transform_8, window_bounds = array<i64: 1, 4, 256>}]} {
    %c0 = arith.constant 0 : index
    %c0_0 = arith.constant 0 : index
    %c0_1 = arith.constant 0 : index
    %0 = vector.load %arg2[%c0, %c0_0, %c0_1] : memref<1x4x256xf32, #tpu.memory_space<vmem>>, vector<1x4x256xf32>
    %1 = vector.shape_cast %0 : vector<1x4x256xf32> to vector<4x256xf32>
    %c0_2 = arith.constant 0 : index
    %c0_3 = arith.constant 0 : index
    %2 = vector.load %arg5[%c0_2, %c0_3] : memref<8x4xf32, #tpu.memory_space<vmem>>, vector<8x4xf32>
    %cst = arith.constant dense<0.000000e+00> : vector<8x256xf32>
    %3 = tpu.matmul %2, %1, %cst {dimension_numbers = #tpu.dot_dimension_numbers<[1], [0], [0], [1], [0, 0, 1, 1], [], []>} : vector<8x4xf32>, vector<4x256xf32>, vector<8x256xf32> -> vector<8x256xf32>
    %c0_4 = arith.constant 0 : index
    %c0_5 = arith.constant 0 : index
    %4 = vector.load %arg6[%c0_4, %c0_5] : memref<8x4xf32, #tpu.memory_space<vmem>>, vector<8x4xf32>
    %c0_6 = arith.constant 0 : index
    %c0_7 = arith.constant 0 : index
    %c0_8 = arith.constant 0 : index
    %5 = vector.load %arg3[%c0_6, %c0_7, %c0_8] : memref<1x4x256xf32, #tpu.memory_space<vmem>>, vector<1x4x256xf32>
    %6 = vector.shape_cast %5 : vector<1x4x256xf32> to vector<4x256xf32>
    %cst_9 = arith.constant dense<0.000000e+00> : vector<8x256xf32>
    %7 = tpu.matmul %4, %6, %cst_9 {dimension_numbers = #tpu.dot_dimension_numbers<[1], [0], [0], [1], [0, 0, 1, 1], [], []>} : vector<8x4xf32>, vector<4x256xf32>, vector<8x256xf32> -> vector<8x256xf32>
    %8 = arith.addf %3, %7 : vector<8x256xf32>
    %c0_10 = arith.constant 0 : index
    %c0_11 = arith.constant 0 : index
    %9 = vector.load %arg7[%c0_10, %c0_11] : memref<8x1xf32, #tpu.memory_space<vmem>>, vector<8x1xf32>
    %10 = vector.broadcast %9 : vector<8x1xf32> to vector<8x256xf32>
    %11 = arith.addf %8, %10 : vector<8x256xf32>
    %c0_12 = arith.constant 0 : index
    %c0_13 = arith.constant 0 : index
    %c0_14 = arith.constant 0 : index
    %12 = vector.load %arg4[%c0_12, %c0_13, %c0_14] : memref<1x8x256xf32, #tpu.memory_space<vmem>>, vector<1x8x256xf32>
    %13 = vector.shape_cast %12 : vector<1x8x256xf32> to vector<8x256xf32>
    %14 = arith.addf %11, %13 : vector<8x256xf32>
    %cst_15 = arith.constant 0.000000e+00 : f32
    %15 = vector.broadcast %cst_15 : f32 to vector<8x256xf32>
    %16 = arith.maximumf %14, %15 : vector<8x256xf32>
    %c0_16 = arith.constant 0 : index
    %c0_17 = arith.constant 0 : index
    %17 = vector.load %arg8[%c0_16, %c0_17] : memref<8x1xf32, #tpu.memory_space<vmem>>, vector<8x1xf32>
    %18 = vector.broadcast %17 : vector<8x1xf32> to vector<8x256xf32>
    %19 = arith.mulf %16, %18 : vector<8x256xf32>
    %cst_18 = arith.constant dense<0.000000e+00> : vector<256xf32>
    %20 = vector.multi_reduction <add>, %19, %cst_18 [0] : vector<8x256xf32> to vector<256xf32>
    %21 = vector.shape_cast %20 : vector<256xf32> to vector<1x256xf32>
    %c0_19 = arith.constant 0 : index
    %c0_20 = arith.constant 0 : index
    %22 = vector.load %arg9[%c0_19, %c0_20] : memref<1x1xf32, #tpu.memory_space<vmem>>, vector<1x1xf32>
    %23 = vector.broadcast %22 : vector<1x1xf32> to vector<1x256xf32>
    %24 = arith.addf %21, %23 : vector<1x256xf32>
    %cst_21 = arith.constant 0.000000e+00 : f32
    %25 = vector.broadcast %cst_21 : f32 to vector<1x256xf32>
    %26 = arith.subf %25, %24 : vector<1x256xf32>
    %27 = math.exp %26 : vector<1x256xf32>
    %cst_22 = arith.constant 1.000000e+00 : f32
    %28 = vector.broadcast %cst_22 : f32 to vector<1x256xf32>
    %29 = arith.addf %28, %27 : vector<1x256xf32>
    %30 = tpu.reciprocal %29 {approx = true} : vector<1x256xf32> -> vector<1x256xf32>
    %31 = vector.broadcast %30 : vector<1x256xf32> to vector<4x256xf32>
    %32 = arith.mulf %1, %31 : vector<4x256xf32>
    %c0_23 = arith.constant 0 : index
    %c0_24 = arith.constant 0 : index
    %c0_25 = arith.constant 0 : index
    %33 = vector.load %arg10[%c0_23, %c0_24, %c0_25] : memref<1x4x256xf32, #tpu.memory_space<vmem>>, vector<1x4x256xf32>
    %34 = vector.shape_cast %33 : vector<1x4x256xf32> to vector<4x256xf32>
    %35 = vector.shape_cast %32 : vector<4x256xf32> to vector<1x4x256xf32>
    tpu.vector_store %arg10[%c0_23, %c0_24, %c0_25], %35 {strides = array<i32>} : memref<1x4x256xf32, #tpu.memory_space<vmem>>, vector<1x4x256xf32>,
    return
  }
  func.func @transform_0(%arg0: i32, %arg1: i32) -> (i32, i32, i32) {
    %c0_i32 = arith.constant 0 : i32
    %c0_i32_0 = arith.constant 0 : i32
    return %arg0, %c0_i32, %arg1 : i32, i32, i32
  }
  func.func @transform_1(%arg0: i32, %arg1: i32) -> (i32, i32, i32) {
    %c0_i32 = arith.constant 0 : i32
    %c0_i32_0 = arith.constant 0 : i32
    return %arg0, %c0_i32, %arg1 : i32, i32, i32
  }
  func.func @transform_2(%arg0: i32, %arg1: i32) -> (i32, i32, i32) {
    %c0_i32 = arith.constant 0 : i32
    %c0_i32_0 = arith.constant 0 : i32
    return %arg0, %c0_i32, %arg1 : i32, i32, i32
  }
  func.func @transform_3(%arg0: i32, %arg1: i32) -> (i32, i32) {
    %c0_i32 = arith.constant 0 : i32
    %c0_i32_0 = arith.constant 0 : i32
    %c0_i32_1 = arith.constant 0 : i32
    return %c0_i32, %c0_i32_0 : i32, i32
  }
  func.func @transform_4(%arg0: i32, %arg1: i32) -> (i32, i32) {
    %c0_i32 = arith.constant 0 : i32
    %c0_i32_0 = arith.constant 0 : i32
    %c0_i32_1 = arith.constant 0 : i32
    return %c0_i32, %c0_i32_0 : i32, i32
  }
  func.func @transform_5(%arg0: i32, %arg1: i32) -> (i32, i32) {
    %c0_i32 = arith.constant 0 : i32
    %c0_i32_0 = arith.constant 0 : i32
    %c0_i32_1 = arith.constant 0 : i32
    return %c0_i32, %c0_i32_0 : i32, i32
  }
  func.func @transform_6(%arg0: i32, %arg1: i32) -> (i32, i32) {
    %c0_i32 = arith.constant 0 : i32
    %c0_i32_0 = arith.constant 0 : i32
    %c0_i32_1 = arith.constant 0 : i32
    return %c0_i32, %c0_i32_0 : i32, i32
  }
  func.func @transform_7(%arg0: i32, %arg1: i32) -> (i32, i32) {
    %c0_i32 = arith.constant 0 : i32
    %c0_i32_0 = arith.constant 0 : i32
    %c0_i32_1 = arith.constant 0 : i32
    return %c0_i32, %c0_i32_0 : i32, i32
  }
  func.func @transform_8(%arg0: i32, %arg1: i32) -> (i32, i32, i32) {
    %c0_i32 = arith.constant 0 : i32
    %c0_i32_0 = arith.constant 0 : i32
    return %arg0, %c0_i32, %arg1 : i32, i32, i32
  }
}

</mosaic_0001>

<bundles_post_ra>
// kernel: tpu_custom_call.1
= control target key start
LH: loop header
LB: loop body
LE: loop exit
PB: predicated region body
PF: predicated region fallthrough
CT: control target
= control target key end

     0   :  { %s1256_s0 = inlined_call_operand.vmem [shape: f32[2,4,256], index: 0, kind: input, shape index: {}]   ;;  %s1257_s1 = inlined_call_operand.hbm [shape: f32[2,4,256], index: 1, kind: input, shape index: {}]   ;;  %s1258_s2 = inlined_call_operand.vmem [shape: f32[2,8,256], index: 2, kind: input, shape index: {}]   ;;  %s1259_s3 = inlined_call_operand.vmem [shape: f32[8,4], index: 3, kind: input, shape index: {}]   ;;  %s1260_s4 = inlined_call_operand.vmem [shape: f32[8,4], index: 4, kind: input, shape index: {}]   ;;  %s1261_s5 = inlined_call_operand.vmem [shape: f32[8,1], index: 5, kind: input, shape index: {}]   ;;  %s1262_s6 = inlined_call_operand.vmem [shape: f32[8,1], index: 6, kind: input, shape index: {}]   ;;  %s1263_s7 = inlined_call_operand.<no memory space> [shape: f32[1,1], index: 7, kind: input, shape index: {}]   ;;  %s1264_s8 = inlined_call_operand.hbm [shape: f32[2,4,256], index: 8, kind: output, shape index: {}]  }
   0x1   :  { %v13_v0 = vstv %s1263_s7 }
   0x2   :  { %14 = vst [vmem:[#allocation2] sm:$0x1] %v13_v0 }
   0x3   :  { %15 = vsyncpa [#allocation4], 0 }
   0x4   :  { %17 = vsyncpa [#allocation4 + $0x1], 0 }
   0x5   :  { %18 = vsyncpa [#allocation5], 0 }
   0x6   :  { %20 = vsyncpa [#allocation5 + $0x1], 0  ;;  %s1054_s29 = smov 0   ;;  %s1056_s30 = smov 0  }
   0x7   :  { %s1058_s9 = smov 0   ;;  %s1060_s10 = smov 0  }
   0x8   :  { %s1062_s11 = smov 0   ;;  %s1064_s12 = smov 0  }
   0x9 LB: > { %s781_s7 = sadd.s32 4294967295, %s1000_s12   ;;  %s782_s13 = sadd.s32 4294967294, %s1000_s12   ;;  %s1000_s12 = sphi %s1064_s12, %s26_s12   ;;  %s996_s11 = sphi %s1062_s11, %s1280_s11   ;;  %s992_s10 = sphi %s1060_s10, %s1279_s10   ;;  %s988_s9 = sphi %s1058_s9, %s1278_s9   ;;  %s984_s30 = sphi %s1056_s30, %s1277_s30   ;;  %s980_s29 = sphi %s1054_s29, %s1276_s29  }
   0xa   : > { %s38_s14 = sadd.s32 1, %s996_s11  ;;  %s75_s15 = sadd.s32 1, %s988_s9 }
   0xb   : > { %p40_p0 = scmp.ge.s32.totalorder %s38_s14, 2  ;;  %p82_p1 = scmp.ne.s32.totalorder %s988_s9, %s984_s30 }
   0xc   : > { %p83_p2 = scmp.eq.s32.totalorder %s1000_s12, 0  ;;  %p88_p3 = scmp.ne.s32.totalorder %s984_s30, %s980_s29 }
   0xd   : > { %s1282_s14 = smov (%p40_p0, %s38_s14), 0  ;;  %p89_p5 = scmp.eq.s32.totalorder %s781_s7, 0 }
   0xe   : > { %p1095_p4 = por %p83_p2, %p82_p1  ;;  %s70_s17 = ssub.s32 %s996_s11, %s1282_s14 }
   0xf   : > { %p247_p6 = scmp.eq.s32.totalorder %s781_s7, 1  ;;  %p73_p7 = scmp.eq.s32.totalorder %s70_s17, 0 }
  0x10   : > { %p1101_p8 = por %p89_p5, %p88_p3  ;;  %p253_p10 = scmp.eq.s32.totalorder %s782_s13, 1 }
  0x11   : > { %p1105_p9 = por %p247_p6, %p82_p1  ;;  %p824_p13 = scmp.lt.s32.totalorder %s1000_s12, 2 }
  0x12   : > { %s1110_s20 = scalar_select %p73_p7, %s988_s9, %s75_s15  }
  0x13   : > { %s1268_s19 = scalar_select %p1105_p9, 1, 0 }
  0x14   : > { %p1112_p11 = por %p253_p10, %p88_p3  ;;  %s301_s22 = sand.u32 1, %s988_s9  }
  0x15   : > { %s785_s23 = sshll.u32 %s301_s22, 3  ;;  %s806_s24 = sshll.u32 %s996_s11, 7 }
  0x16   : > { %s1269_s21 = scalar_select %p1112_p11, 1, 0 }
  0x17   : > { %s1123_s27 = scalar_lea.hbm %s1257_s1, %s806_s24  ;;  %s305_s28 = scalar_lea.vmem [#allocation3], %s785_s23 }
  0x18   : > { %s315_s7 = sshll.u32 %s305_s28, 4  ;;  %p1129_p0 = pnand %p824_p13, %p1095_p4  ;;  %s1125_s7 = int_to_ptr.vmem [resolvable:$true] %s315_s7 }
  0x19   : > { %s302_s15 = scalar_lea.sflag [#allocation4], %s301_s22  ;;  %s888_s17 = scalar_lea.hbm %s1123_s27, 128 }
  0x1a   : > { %p889_p3 = scmp.ne.s32.totalorder %s1123_s27, %s888_s17  ;;  %p890_p5 = pneg %p1129_p0 }
  0x1b   : > { %s893_s16 = scalar_lea.hbm %s1257_s1, 256  ;;  %p894_p4 = scmp.lt.u32.totalorder %s1123_s27, %s1257_s1 }
  0x1c   : > { %p891_p6 = pnand %p890_p5, %p889_p3  ;;  %p895_p10 = scmp.lt.u32.totalorder %s893_s16, %s888_s17 }
  0x1d   : > { %p897_p12 = scmp.lt.u32.totalorder %s888_s17, %s1123_s27 }
  0x1e   : > { %p892_p7 = pneg %p891_p6  ;;  %p896_p13 = por %p895_p10, %p894_p4 }
  0x20   : > { %p898_p1 = por %p897_p12, %p896_p13 }
  0x22   : > { %p899_p2 = pnand %p898_p1, %p892_p7 }
  0x24   : > { %902 = shalt.err (!%p899_p2)
}
  0x25   : > { %s903_s22 = scalar_lea.vmem %s1125_s7, 128  ;;  %s1002_s28 = smov [#allocation3]  }
  0x26   : > { %p904_p3 = scmp.ne.s32.totalorder %s1125_s7, %s903_s22  ;;  %s908_s23 = sshll.u32 %s1002_s28, 4  ;;  %s909_s23 = int_to_ptr.vmem [resolvable:$false] %s908_s23 }
  0x27   : > { %s910_s24 = scalar_lea.vmem %s909_s23, 256  ;;  %p911_p9 = scmp.lt.s32.totalorder %s1125_s7, %s909_s23 }
  0x28   : > { %p906_p6 = pnand %p904_p3, %p890_p5  ;;  %p912_p4 = scmp.lt.s32.totalorder %s910_s24, %s903_s22 }
  0x2a   : > { %p907_p11 = pneg %p906_p6  ;;  %p913_p10 = por %p912_p4, %p911_p9 }
  0x2c   : > { %p914_p12 = pnand %p913_p10, %p907_p11 }
  0x2e   : > { %917 = shalt.err (!%p914_p12)
}
  0x2f   : > { %819 = dma.hbm_to_vmem [thread:$0]  (!%p1129_p0), %s1123_s27, 128, %s1125_s7, %s302_s15  }
  0x30   : > { %p1271_p1 = scmp.lt.s32.totalorder %s1000_s12, 3  ;;  %p1272_p2 = scmp.ge.s32.totalorder %s1000_s12, 1 }
  0x32   : > { %p334_p5 = pnand %p1272_p2, %p1271_p1 }
  0x33   : > { %s1165_s17 = sand.u32 (!%p334_p5), 1, %s984_s30  }
  0x34   : > { %337 = sbr.rel (%p334_p5) target bundleno = 354 (0x162), region = 52  ;;  %s789_s16 = sshll.u32 (!%p334_p5), %s1165_s17, 3 }
  0x35   : > { %s340_s25 = scalar_lea.sflag (!%p334_p5), [#allocation4], %s1165_s17  ;;  %s343_s13 = scalar_lea.vmem (!%p334_p5), [#allocation3], %s789_s16 }
  0x3b   : > { %971 = dma.done.wait (%p1101_p8), %s340_s25, 128  }
  0x3c   : > { %973 = vsyncadd (%p1101_p8), %s340_s25, 4294967168  ;;  %p395_p9 = scmp.lt.s32.totalorder %s992_s10, 1  ;;  %v1003_v1 = vmov 0.0   ;;  %v1004_v2 = vmov 0   ;;  %v419_v3 = vld [vmem:[%s343_s13] sm:$0xff]  ;;  %vm426_vm0 = vcmask 1043456   ;;  %v622_v26 = vlaneseq }
  0x3d   : > { %495 = vmatprep.mubr.f32.mxu1 %v1003_v1  ;;  %575 = vmatprep.mubr.f32.mxu0 %v1003_v1  ;;  %v421_v5 = vcombine.high %v419_v3, %v419_v3  ;;  %v582_v7 = vld [vmem:[%s1261_s5] sm:$0xff]  ;;  %vm422_vm1 = vcmask 31744   ;;  %s393_s23 = scalar_lea.vmem [#allocation6], %s789_s16  ;;  %p1273_p11 = scmp.ne.s32.totalorder %s1268_s19, 0 }
  0x3e   : > { %s396_s27 = scalar_select %p395_p9, %s992_s10, 1  ;;  %876 = vset.pattern.permute.xlu0 %v1004_v2  ;;  %877 = vset.pattern.permute.xlu1 %v1004_v2  ;;  %v418_v8 = vld [vmem:[%s1260_s4] sm:$0xff]  ;;  %v623_v32 = vshrl.u32 %v622_v26, 7 }
  0x3f   : > { %v417_v9 = vld [vmem:[%s1259_s3] sm:$0xff]  ;;  %585 = vperm.xlu0 %876, %v582_v7   ;;  %795 = vmatprep.subr.msk.mxu1 %vm426_vm0, %v421_v5  ;;  %s661_s24 = sshll.u32 %s393_s23, 4  ;;  %s1209_s24 = int_to_ptr.vmem [resolvable:$true] %s661_s24 }
  0x40   : > { %s807_s7 = sshll.u32 %s396_s27, 3  ;;  %v596_v10 = vld [vmem:[%s1262_s6] sm:$0xff]  ;;  %796 = vmatpush1.msk.msra.mxu1 %vm426_vm0, %v419_v3  ;;  %s808_s26 = sshll.u32 %s396_s27, 4  ;;  %v624_v37 = vsub.s32 0, %v623_v32 }
  0x41   : > { %s402_s22 = scalar_lea.vmem %s1256_s0, %s807_s7  ;;  %v616_v11 = vld [vmem:[#allocation2] sm:$0x1]  ;;  %797 = vmatmul.mubr.msk.f32.vlgmr.msra.gmra.mrb[0].mxu1 %vm422_vm1, %v418_v8  ;;  %s413_s28 = scalar_lea.vmem %s1258_s2, %s808_s26 }
  0x42   : > { %v1180_v4 = vld [vmem:[%s402_s22] sm:$0xff]  ;;  %619 = vperm.xlu1 %877, %v616_v11   ;;  %v591_v21 = vld [vmem:[%s413_s28 + $0x8] sm:$0xff]  ;;  %s809_s27 = sshll.u32 %s992_s10, 7  ;;  %s645_s7 = scalar_lea.sflag [#allocation5], %s1165_s17 }
  0x43   : > { %v503_v6 = vcombine.high %v1180_v4, %v1180_v4  ;;  %599 = vperm.xlu0 %876, %v596_v10   ;;  %v590_v19 = vld [vmem:[%s413_s28] sm:$0xff]  ;;  %s1207_s13 = scalar_lea.hbm %s1264_s8, %s809_s27  ;;  %s918_s26 = scalar_lea.vmem %s1209_s24, 128 }
  0x44   : > { %p919_p8 = scmp.ne.s32.totalorder %s1209_s24, %s918_s26  ;;  %s1005_s10 = smov [#allocation6]  }
  0x45   : > { %798 = vmatprep.subr.msk.mxu0 %vm426_vm0, %v503_v6  ;;  %s922_s16 = sshll.u32 %s1005_s10, 4  ;;  %s923_s16 = int_to_ptr.vmem [resolvable:$false] %s922_s16 }
  0x46   : > { %799 = vmatpush1.msk.msra.mxu0 %vm426_vm0, %v1180_v4  ;;  %p920_p0 = pnand %p919_p8, %p1273_p11  ;;  %s924_s22 = scalar_lea.vmem %s923_s16, 256 }
  0x47   : > { %800 = vmatmul.mubr.msk.f32.vlgmr.msra.gmra.mrb[0].mxu0 %vm422_vm1, %v417_v9  ;;  %p925_p13 = scmp.lt.s32.totalorder %s1209_s24, %s923_s16  ;;  %p926_p3 = scmp.lt.s32.totalorder %s924_s22, %s918_s26 }
  0x48   : > { %p921_p7 = pneg %p920_p0 }
  0x49   : > { %p927_p6 = por %p926_p3, %p925_p13 }
  0x4b   : > { %p928_p4 = pnand %p927_p6, %p921_p7 }
  0xbe   : > { %v586_v17 = vpop.permute.xlu0 %585 }
  0xc1   : > { %v620_v39 = vpop.permute.xlu1 %619 }
  0xc2   : > { %v600_v27 = vpop.permute.xlu0 %599  ;;  %v625_v43 = vrot.slane %v620_v39, %v624_v37 }
 0x114   : > { %v497_v12 = vpop.f32.mrb[0].mxu1 }
 0x115   : > { %v499_v15 = vpop.f32.mrb[1].mxu1 }
 0x11a   : > { %v577_v13 = vpop.f32.mrb[0].mxu0 }
 0x11b   : > { %v578_v14 = vadd.f32 %v577_v13, %v497_v12  ;;  %v579_v16 = vpop.f32.mrb[1].mxu0 }
 0x11c   : > { %v580_v18 = vadd.f32 %v579_v16, %v499_v15 }
 0x11d   : > { %v588_v20 = vadd.f32 %v586_v17, %v578_v14 }
 0x11e   : > { %v589_v22 = vadd.f32 %v586_v17, %v580_v18 }
 0x11f   : > { %v592_v23 = vadd.f32 %v590_v19, %v588_v20 }
 0x120   : > { %v593_v24 = vadd.f32 %v591_v21, %v589_v22 }
 0x121   : > { %v594_v25 = vmax.f32 %v592_v23, 0.0 }
 0x122   : > { %v595_v28 = vmax.f32 %v593_v24, 0.0 }
 0x123   : > { %v602_v29 = vmul.f32 %v600_v27, %v594_v25 }
 0x124   : > { %v603_v30 = vmul.f32 %v600_v27, %v595_v28 }
 0x125   : > { %v604_v31 = vrot.slane %v602_v29, 4 }
 0x126   : > { %v610_v33 = vrot.slane %v603_v30, 4 }
 0x127   : > { %v605_v34 = vadd.f32 %v604_v31, %v602_v29 }
 0x128   : > { %v611_v35 = vadd.f32 %v610_v33, %v603_v30 }
 0x129   : > { %v606_v36 = vrot.slane %v605_v34, 2 }
 0x12a   : > { %v612_v38 = vrot.slane %v611_v35, 2 }
 0x12b   : > { %v607_v40 = vadd.f32 %v606_v36, %v605_v34 }
 0x12c   : > { %v613_v41 = vadd.f32 %v612_v38, %v611_v35 }
 0x12d   : > { %v608_v42 = vrot.slane %v607_v40, 1 }
 0x12e   : > { %v614_v44 = vrot.slane %v613_v41, 1 }
 0x12f   : > { %v609_v45 = vadd.f32 %v608_v42, %v607_v40 }
 0x130   : > { %v615_v46 = vadd.f32 %v614_v44, %v613_v41 }
 0x131   : > { %v626_v47 = vadd.f32 %v625_v43, %v609_v45 }
 0x132   : > { %v627_v48 = vadd.f32 %v625_v43, %v615_v46 }
 0x133   : > { %v628_v49 = vsub.f32 0.0, %v626_v47 }
 0x134   : > { %v629_v50 = vsub.f32 0.0, %v627_v48 }
 0x135   : > { %v630_v51 = vmul.f32 1.442695, %v628_v49 }
 0x136   : > { %v632_v52 = vmul.f32 1.442695, %v629_v50 }
 0x137   : > { %880 = vpow2.f32 %v630_v51 }
 0x138   : > { %882 = vpow2.f32 %v632_v52 }
 0x141   : > { %v881_v53 = vpop.eup %880 }
 0x142   : > { %v883_v54 = vpop.eup %882  ;;  %v634_v55 = vadd.f32 1.0, %v881_v53 }
 0x143   : > { %v635_v56 = vadd.f32 1.0, %v883_v54 }
 0x144   : > { %884 = vrcp.f32 %v634_v55 }
 0x145   : > { %886 = vrcp.f32 %v635_v56 }
 0x14e   : > { %v885_v57 = vpop.eup %884 }
 0x14f   : > { %v887_v58 = vpop.eup %886 }
 0x150   : > { %v640_v59 = vcombine.low %v885_v57, %v887_v58 }
 0x152   : > { %v642_v60 = vmul.f32 %v640_v59, %v1180_v4 }
 0x154   : > { %643 = vst [vmem:[%s393_s23] sm:$0xff] %v642_v60 }
 0x155   : > { %931 = shalt.err (!%p928_p4)
}
 0x156   : > { %s932_s17 = scalar_lea.hbm %s1207_s13, 128  ;;  %s936_s27 = scalar_lea.hbm %s1264_s8, 256 }
 0x157   : > { %p933_p10 = scmp.ne.s32.totalorder %s1207_s13, %s932_s17  ;;  %p937_p2 = scmp.lt.u32.totalorder %s1207_s13, %s1264_s8 }
 0x158   : > { %p938_p5 = scmp.lt.u32.totalorder %s936_s27, %s932_s17  ;;  %p940_p8 = scmp.lt.u32.totalorder %s932_s17, %s1207_s13 }
 0x159   : > { %p934_p12 = pnand %p933_p10, %p1273_p11 }
 0x15a   : > { %p939_p9 = por %p938_p5, %p937_p2 }
 0x15b   : > { %p935_p1 = pneg %p934_p12 }
 0x15c   : > { %p941_p0 = por %p940_p8, %p939_p9 }
 0x15e   : > { %p942_p7 = pnand %p941_p0, %p935_p1 }
 0x160   : > { %945 = shalt.err (!%p942_p7)
}
 0x161   : > { %814 = dma.vmem_to_hbm [thread:$0]  (%p1273_p11), %s1209_s24, 128, %s1207_s13, %s645_s7  }
 0x162 PF: > { %s673_s15 = sand.u32 1, %s980_s29   ;;  %p1274_p13 = scmp.ne.s32.totalorder %s1269_s21, 0 }
 0x163   : > { %p1275_p3 = scmp.ge.s32.totalorder %s1000_s12, 2  ;;  %s674_s26 = scalar_lea.sflag [#allocation5], %s673_s15 }
 0x165   : > { %p821_p6 = pnand %p1275_p3, %p1274_p13 }
 0x167   : > { %975 = dma.done.wait (!%p821_p6), %s674_s26, 128  }
 0x168   : > { %977 = vsyncadd (!%p821_p6), %s674_s26, 4294967168  ;;  %s26_s12 = sadd.s32 1, %s1000_s12   ;;  %s1276_s29 = smov %s984_s30 }
 0x169   : > { %p23_p4 = scmp.ge.s32.totalorder %s26_s12, 4   ;;  %s1277_s30 = smov %s988_s9 }
 0x16a   : > { %s1278_s9 = smov %s1110_s20  ;;  %s1279_s10 = smov %s996_s11 }
 0x16b   : > { %s1280_s11 = smov %s1282_s14  ;;  %25 = sbr.rel (!%p23_p4) target bundleno = 9 (0x9), region = 103 }
 0x172   :  { %679 = vsyncpa [#allocation4], 1 }
 0x173   :  { %681 = vsyncpa [#allocation4 + $0x1], 1 }
 0x174   :  { %682 = vsyncpa [#allocation5], 1 }
 0x175   :  { %684 = vsyncpa [#allocation5 + $0x1], 1 }

</bundles_post_ra>
